<compile_context>
chip_gen: v5e
topology: v5e:2x2
jax: 0.10.0
libtpu: 0.0.40
codegen_flags: <defaults>
</compile_context>

<pallas_src>
import functools

import jax
import jax.numpy as jnp
from jax.experimental import pallas as pl
from jax.experimental.pallas import tpu as pltpu

LANES = 128  # TPU vreg lane width


def _fused_head_kernel(xp_ref, bp_ref, wa_ref, wb_ref, c_ref, out_ref):
    """out = sigmoid(xp @ WA + boxp @ WB + c); every tile is lane-dense."""
    y = jnp.dot(xp_ref[...], wa_ref[...], preferred_element_type=jnp.float32)
    y = y + jnp.dot(bp_ref[...], wb_ref[...], preferred_element_type=jnp.float32)
    y = y + c_ref[...]
    out_ref[...] = jax.nn.sigmoid(y).astype(out_ref.dtype)


def fuse_head_params(params, input_dim):
    """Collapse box_embedding -> dense -> feed_forward into one affine map and
    build the lane-packed (kron) weights.  Call ONCE per parameter set."""
    w_box, b_box = params["w_box"], params["b_box"]
    w_dense, b_dense = params["w_dense"], params["b_dense"]
    w_ff, b_ff = params["w_ff"], params["b_ff"]
    box_emb = w_box.shape[1]
    output_dim = w_ff.shape[1]
    assert LANES % output_dim == 0, "output_dim must divide 128 for lane packing"
    pack = LANES // output_dim

    w_dense_x = w_dense[:input_dim, :]            # rows for the `x` part of concat
    w_dense_b = w_dense[input_dim:, :]            # rows for the `box_embed` part

    t = (w_dense_b + jnp.eye(box_emb, dtype=jnp.float32)) @ w_ff   # (64, out)
    a = w_dense_x @ w_ff                                           # (input_dim, out)
    bm = w_box @ t                                                 # (box_dim, out)
    c = b_box @ t + b_dense @ w_ff + b_ff                          # (out,)

    eye = jnp.eye(pack, dtype=jnp.float32)
    wa = jnp.kron(eye, a)                                          # (PACK*in,  128)
    wb = jnp.kron(eye, bm)                                         # (PACK*box, 128)
    c_packed = jnp.tile(c, pack).reshape(1, pack * output_dim)     # (1, 128), stays f32
    return wa, wb, c_packed


def linear_head_forward(x, box, wa, wb, c_packed, *, output_dim, tm_rows=8192):
    """Pallas implementation of Linear_head.forward.

    x:   (B, S, input_dim)
    box: (B, S, box_dim)
    wa/wb/c_packed: output of fuse_head_params (hoisted out of this path)
    returns (wh, xy, None, None, None) matching the PyTorch module.
    """
    B, S, input_dim = x.shape
    box_dim = box.shape[-1]
    pack = LANES // output_dim
    M = B * S

    # Stream in the producer's dtype (bf16 knob for v5e/v6e); weights are tiny
    # so casting them here is free.  Accumulation stays f32 inside the kernel.
    stream_dtype = x.dtype
    wa = wa.astype(stream_dtype)
    wb = wb.astype(stream_dtype)
    c_packed = c_packed.astype(jnp.float32)

    x2 = x.reshape(M, input_dim)
    box2 = box.reshape(M, box_dim)

    # Pad only to a multiple of PACK (often zero-cost); NO padding to tm_rows.
    m_pad = pl.cdiv(M, pack) * pack
    if m_pad != M:
        x2 = jnp.pad(x2, ((0, m_pad - M), (0, 0)))
        box2 = jnp.pad(box2, ((0, m_pad - M), (0, 0)))

    rows_p = m_pad // pack                         # packed rows total
    xp = x2.reshape(rows_p, pack * input_dim)      # free contiguous reshapes,
    bp = box2.reshape(rows_p, pack * box_dim)      # no concat / extra HBM pass

    # ---- row-tile selection (packed rows per grid step) --------------------
    min_tmp = 8                                    # 8 sublanes of packed rows
    tmp_req = max(min_tmp, tm_rows // pack)
    if rows_p <= min_tmp:
        tmp = rows_p                               # single tiny step (block == full array)
    elif rows_p <= tmp_req:
        # Enough work for tiling but less than one full tile: split into >= 2
        # steps so the "parallel" axis maps onto both v7x TensorCores.
        tmp = ((pl.cdiv(rows_p, 2) + min_tmp - 1) // min_tmp) * min_tmp
    else:
        tmp = tmp_req

    # ---- explicit VMEM budget (double-buffered tiles + kron weights) -------
    def _vmem_need(t):
        bpe = jnp.dtype(stream_dtype).itemsize
        tiles = t * pack * (input_dim + box_dim) * bpe + t * pack * output_dim * 4
        wts = (pack * (input_dim + box_dim)) * pack * output_dim * bpe \
            + pack * output_dim * 4
        return 2 * (tiles + wts)                   # 2x: double buffering

    budget = 44 << 20                              # safe under v7x's 64 MiB physical VMEM
    while tmp > min_tmp and _vmem_need(tmp) > budget:
        tmp = max(min_tmp, ((tmp // 2 + min_tmp - 1) // min_tmp) * min_tmp)

    grid = pl.cdiv(rows_p, tmp)                    # partial last block allowed
    vmem_limit = int(min(max(_vmem_need(tmp) + (4 << 20), 32 << 20), 56 << 20))

    out_packed = pl.pallas_call(
        _fused_head_kernel,
        out_shape=jax.ShapeDtypeStruct((rows_p, pack * output_dim), jnp.float32),
        grid=(grid,),
        in_specs=[
            pl.BlockSpec((tmp, pack * input_dim), lambda i: (i, 0)),
            pl.BlockSpec((tmp, pack * box_dim), lambda i: (i, 0)),
            pl.BlockSpec((pack * input_dim, pack * output_dim), lambda i: (0, 0)),
            pl.BlockSpec((pack * box_dim, pack * output_dim), lambda i: (0, 0)),
            pl.BlockSpec((1, pack * output_dim), lambda i: (0, 0)),
        ],
        out_specs=pl.BlockSpec((tmp, pack * output_dim), lambda i: (i, 0)),
        compiler_params=pltpu.CompilerParams(
            dimension_semantics=("parallel",),     # megacore split on v7x
            vmem_limit_bytes=vmem_limit,
        ),
    )(xp, bp, wa, wb, c_packed)

    out = out_packed.reshape(m_pad, output_dim)[:M].reshape(B, S, output_dim)
    xy = out[:, :, :2]
    wh = out[:, :, 2:]
    return (wh, xy, None, None, None)


def init_params(key, input_dim, box_dim, output_dim, box_emb=64):
    """Deterministic parameter init (shapes match the nn.Linear layers)."""
    ks = jax.random.split(key, 6)
    # Stored as (in, out) so forward does `act @ W` (== x @ weight.T in torch).
    scale = 0.05
    return {
        "w_box":   scale * jax.random.normal(ks[0], (box_dim, box_emb), jnp.float32),
        "b_box":   scale * jax.random.normal(ks[1], (box_emb,), jnp.float32),
        "w_dense": scale * jax.random.normal(ks[2], (input_dim + box_emb, box_emb), jnp.float32),
        "b_dense": scale * jax.random.normal(ks[3], (box_emb,), jnp.float32),
        "w_ff":    scale * jax.random.normal(ks[4], (box_emb, output_dim), jnp.float32),
        "b_ff":    scale * jax.random.normal(ks[5], (output_dim,), jnp.float32),
    }


def reference_forward(x, box, params):
    """Pure-JAX reference matching the PyTorch forward exactly."""
    box_embed = box @ params["w_box"] + params["b_box"]
    h = jnp.concatenate([x, box_embed], axis=-1) @ params["w_dense"] + params["b_dense"]
    y = (h + box_embed) @ params["w_ff"] + params["b_ff"]
    y = jax.nn.sigmoid(y)
    return y[:, :, 2:], y[:, :, :2]


if __name__ == "__main__":
    B, S = 2, 8
    input_dim, box_dim, output_dim = 32, 4, 4

    key = jax.random.PRNGKey(0)
    kx, kb, kp = jax.random.split(key, 3)
    x = jax.random.normal(kx, (B, S, input_dim), jnp.float32)
    box = jax.random.normal(kb, (B, S, box_dim), jnp.float32)
    params = init_params(kp, input_dim, box_dim, output_dim)

    # Weight fusion + kron packing hoisted out of the per-call path.
    wa, wb, c_packed = fuse_head_params(params, input_dim)

    fwd = jax.jit(functools.partial(linear_head_forward,
                                    output_dim=output_dim, tm_rows=8192))
    wh, xy, _, _, _ = fwd(x, box, wa, wb, c_packed)
    jax.block_until_ready((wh, xy))

    wh_ref, xy_ref = reference_forward(x, box, params)
    assert wh.shape == (B, S, output_dim - 2)
    assert xy.shape == (B, S, 2)
    assert jnp.allclose(wh, wh_ref, atol=2e-5), float(jnp.max(jnp.abs(wh - wh_ref)))
    assert jnp.allclose(xy, xy_ref, atol=2e-5), float(jnp.max(jnp.abs(xy - xy_ref)))

    print("KERNEL_OK")
</pallas_src>

<mosaic_0001>
module attributes {stable_mosaic.version = 11 : i64} {
  func.func @_fused_head_kernel(%arg0: i32, %arg1: memref<1x1024xf32, #tpu.memory_space<vmem>>, %arg2: memref<1x128xf32, #tpu.memory_space<vmem>>, %arg3: memref<1024x128xf32, #tpu.memory_space<vmem>>, %arg4: memref<128x128xf32, #tpu.memory_space<vmem>>, %arg5: memref<1x128xf32, #tpu.memory_space<vmem>>, %arg6: memref<1x128xf32, #tpu.memory_space<vmem>>) attributes {dimension_semantics = [#tpu.dimension_semantics<parallel>], iteration_bounds = array<i64: 1>, scalar_prefetch = 0 : i64, scratch_operands = 0 : i64, tpu.core_type = #tpu.core_type<tc>, window_params = [{transform_indices = @transform_0, window_bounds = array<i64: 1, 1024>}, {transform_indices = @transform_1, window_bounds = array<i64: 1, 128>}, {pipeline_mode = #tpu.pipeline_mode<synchronous>, transform_indices = @transform_2, window_bounds = array<i64: 1024, 128>}, {pipeline_mode = #tpu.pipeline_mode<synchronous>, transform_indices = @transform_3, window_bounds = array<i64: 128, 128>}, {pipeline_mode = #tpu.pipeline_mode<synchronous>, transform_indices = @transform_4, window_bounds = array<i64: 1, 128>}, {transform_indices = @transform_5, window_bounds = array<i64: 1, 128>}]} {
    %c0 = arith.constant 0 : index
    %c0_0 = arith.constant 0 : index
    %0 = vector.load %arg1[%c0, %c0_0] : memref<1x1024xf32, #tpu.memory_space<vmem>>, vector<1x1024xf32>
    %c0_1 = arith.constant 0 : index
    %c0_2 = arith.constant 0 : index
    %1 = vector.load %arg3[%c0_1, %c0_2] : memref<1024x128xf32, #tpu.memory_space<vmem>>, vector<1024x128xf32>
    %cst = arith.constant dense<0.000000e+00> : vector<1x128xf32>
    %2 = tpu.matmul %0, %1, %cst {dimension_numbers = #tpu.dot_dimension_numbers<[1], [0], [0], [1], [0, 0, 1, 1], [], []>} : vector<1x1024xf32>, vector<1024x128xf32>, vector<1x128xf32> -> vector<1x128xf32>
    %c0_3 = arith.constant 0 : index
    %c0_4 = arith.constant 0 : index
    %3 = vector.load %arg2[%c0_3, %c0_4] : memref<1x128xf32, #tpu.memory_space<vmem>>, vector<1x128xf32>
    %c0_5 = arith.constant 0 : index
    %c0_6 = arith.constant 0 : index
    %4 = vector.load %arg4[%c0_5, %c0_6] : memref<128x128xf32, #tpu.memory_space<vmem>>, vector<128x128xf32>
    %cst_7 = arith.constant dense<0.000000e+00> : vector<1x128xf32>
    %5 = tpu.matmul %3, %4, %cst_7 {dimension_numbers = #tpu.dot_dimension_numbers<[1], [0], [0], [1], [0, 0, 1, 1], [], []>} : vector<1x128xf32>, vector<128x128xf32>, vector<1x128xf32> -> vector<1x128xf32>
    %6 = arith.addf %2, %5 : vector<1x128xf32>
    %c0_8 = arith.constant 0 : index
    %c0_9 = arith.constant 0 : index
    %7 = vector.load %arg5[%c0_8, %c0_9] : memref<1x128xf32, #tpu.memory_space<vmem>>, vector<1x128xf32>
    %8 = arith.addf %6, %7 : vector<1x128xf32>
    %9 = arith.negf %8 : vector<1x128xf32>
    %10 = math.exp %9 : vector<1x128xf32>
    %cst_10 = arith.constant 1.000000e+00 : f32
    %11 = vector.broadcast %cst_10 : f32 to vector<1x128xf32>
    %12 = arith.addf %11, %10 : vector<1x128xf32>
    %13 = arith.divf %11, %12 : vector<1x128xf32>
    %c0_11 = arith.constant 0 : index
    %c0_12 = arith.constant 0 : index
    %14 = vector.load %arg6[%c0_11, %c0_12] : memref<1x128xf32, #tpu.memory_space<vmem>>, vector<1x128xf32>
    tpu.vector_store %arg6[%c0_11, %c0_12], %13 {strides = array<i32>} : memref<1x128xf32, #tpu.memory_space<vmem>>, vector<1x128xf32>,
    return
  }
  func.func @transform_0(%arg0: i32) -> (i32, i32) {
    %c0_i32 = arith.constant 0 : i32
    %c0_i32_0 = arith.constant 0 : i32
    return %arg0, %c0_i32 : i32, i32
  }
  func.func @transform_1(%arg0: i32) -> (i32, i32) {
    %c0_i32 = arith.constant 0 : i32
    %c0_i32_0 = arith.constant 0 : i32
    return %arg0, %c0_i32 : i32, i32
  }
  func.func @transform_2(%arg0: i32) -> (i32, i32) {
    %c0_i32 = arith.constant 0 : i32
    %c0_i32_0 = arith.constant 0 : i32
    %c0_i32_1 = arith.constant 0 : i32
    return %c0_i32, %c0_i32_0 : i32, i32
  }
  func.func @transform_3(%arg0: i32) -> (i32, i32) {
    %c0_i32 = arith.constant 0 : i32
    %c0_i32_0 = arith.constant 0 : i32
    %c0_i32_1 = arith.constant 0 : i32
    return %c0_i32, %c0_i32_0 : i32, i32
  }
  func.func @transform_4(%arg0: i32) -> (i32, i32) {
    %c0_i32 = arith.constant 0 : i32
    %c0_i32_0 = arith.constant 0 : i32
    %c0_i32_1 = arith.constant 0 : i32
    return %c0_i32, %c0_i32_0 : i32, i32
  }
  func.func @transform_5(%arg0: i32) -> (i32, i32) {
    %c0_i32 = arith.constant 0 : i32
    %c0_i32_0 = arith.constant 0 : i32
    return %arg0, %c0_i32 : i32, i32
  }
}

</mosaic_0001>

<bundles_post_ra>
// kernel: linear_head_forward.1
= control target key start
LH: loop header
LB: loop body
LE: loop exit
PB: predicated region body
PF: predicated region fallthrough
CT: control target
= control target key end

     0   :  { %10 = vsyncpa [#allocation3], 0  ;;  %s546_s0 = inlined_call_operand.vmem [shape: f32[1,1024], index: 0, kind: input, shape index: {}]   ;;  %s547_s1 = inlined_call_operand.vmem [shape: f32[1,128], index: 1, kind: input, shape index: {}]   ;;  %s548_s2 = inlined_call_operand.hbm [shape: f32[1024,128], index: 2, kind: input, shape index: {}]   ;;  %s549_s3 = inlined_call_operand.hbm [shape: f32[128,128], index: 3, kind: input, shape index: {}]   ;;  %s550_s4 = inlined_call_operand.vmem [shape: f32[1,128], index: 4, kind: input, shape index: {}]   ;;  %s551_s5 = inlined_call_operand.vmem [shape: f32[1,128], index: 5, kind: output, shape index: {}]  }
   0x1   :  { %s20_s20 = sshll.u32 %s548_s2, 4  ;;  %s21_s20 = int_to_ptr.hbm [resolvable:$true] %s20_s20 }
   0x2   :  { %11 = vsyncpa [#allocation5], 0  ;;  %s484_s21 = smov [#allocation2]   ;;  %s33_s25 = sshll.u32 %s549_s3, 4  ;;  %s34_s25 = int_to_ptr.hbm [resolvable:$true] %s33_s25 }
   0x3   :  { %s22_s22 = sshll.u32 %s484_s21, 4  ;;  %s485_s26 = smov 128   ;;  %s23_s22 = int_to_ptr.vmem [resolvable:$true] %s22_s22 }
   0x4   :  { %s486_s27 = smov 8   ;;  %s487_s28 = smov [#allocation4]  }
   0x5   :  { %28 = dma.hbm_to_vmem [thread:$0]  %s21_s20, 16384, %s23_s22, [#allocation3], %s485_s26, %s485_s26, %s486_s27  }
   0x6   :  { %s35_s29 = sshll.u32 %s487_s28, 4  ;;  %s36_s29 = int_to_ptr.vmem [resolvable:$true] %s35_s29 }
   0x7   :  { %41 = dma.hbm_to_vmem [thread:$0]  %s34_s25, 2048, %s36_s29, [#allocation5], %s485_s26, %s485_s26, %s486_s27  }
   0x8   :  { %480 = dma.done.wait [#allocation3], 16384  }
   0x9   :  { %481 = vsyncadd [#allocation3], 4294950912 }
   0xa   :  { %482 = dma.done.wait [#allocation5], 2048  }
   0xb   :  { %483 = vsyncadd [#allocation5], 4294965248  ;;  %v197_v0 = vld [vmem:[#allocation4 + $0x78] sm:$0xff]  ;;  %v196_v1 = vld [vmem:[#allocation4 + $0x70] sm:$0xff] }
   0xc   :  { %198 = vmatpush.msra.mxu0 %v197_v0  ;;  %v84_v2 = vld [vmem:[#allocation2 + $0xf8] sm:$0xff]  ;;  %v83_v3 = vld [vmem:[#allocation2 + $0xf0] sm:$0xff]  ;;  %v195_v4 = vld [vmem:[#allocation4 + $0x68] sm:$0xff] }
   0xd   :  { %255 = vmatpush.msra.mxu2 %v84_v2  ;;  %v100_v5 = vld [vmem:[#allocation2 + $0x178] sm:$0xff]  ;;  %v82_v7 = vld [vmem:[#allocation2 + $0xe8] sm:$0xff]  ;;  %v99_v8 = vld [vmem:[#allocation2 + $0x170] sm:$0xff] }
   0xe   :  { %v68_v6 = vld [vmem:[#allocation2 + $0x78] sm:$0xff]  ;;  %199 = vmatpush.msra.mxu0 %v196_v1  ;;  %275 = vmatpush.msra.mxu3 %v100_v5  ;;  %v194_v9 = vld [vmem:[#allocation4 + $0x60] sm:$0xff]  ;;  %v67_v10 = vld [vmem:[#allocation2 + $0x70] sm:$0xff] }
   0xf   :  { %256 = vmatpush.msra.mxu2 %v83_v3  ;;  %235 = vmatpush.msra.mxu1 %v68_v6  ;;  %v98_v11 = vld [vmem:[#allocation2 + $0x168] sm:$0xff]  ;;  %v81_v12 = vld [vmem:[#allocation2 + $0xe0] sm:$0xff]  ;;  %v193_v14 = vld [vmem:[#allocation4 + $0x58] sm:$0xff] }
  0x10   :  { %200 = vmatpush.msra.mxu0 %v195_v4  ;;  %276 = vmatpush.msra.mxu3 %v99_v8  ;;  %v66_v13 = vld [vmem:[#allocation2 + $0x68] sm:$0xff]  ;;  %v97_v15 = vld [vmem:[#allocation2 + $0x160] sm:$0xff]  ;;  %v80_v16 = vld [vmem:[#allocation2 + $0xd8] sm:$0xff] }
  0x11   :  { %257 = vmatpush.msra.mxu2 %v82_v7  ;;  %236 = vmatpush.msra.mxu1 %v67_v10  ;;  %v65_v17 = vld [vmem:[#allocation2 + $0x60] sm:$0xff]  ;;  %v192_v18 = vld [vmem:[#allocation4 + $0x50] sm:$0xff]  ;;  %v96_v19 = vld [vmem:[#allocation2 + $0x158] sm:$0xff] }
  0x12   :  { %201 = vmatpush.msra.mxu0 %v194_v9  ;;  %277 = vmatpush.msra.mxu3 %v98_v11  ;;  %v79_v20 = vld [vmem:[#allocation2 + $0xd0] sm:$0xff]  ;;  %v64_v21 = vld [vmem:[#allocation2 + $0x58] sm:$0xff]  ;;  %v191_v22 = vld [vmem:[#allocation4 + $0x48] sm:$0xff] }
  0x13   :  { %258 = vmatpush.msra.mxu2 %v81_v12  ;;  %237 = vmatpush.msra.mxu1 %v66_v13  ;;  %v95_v23 = vld [vmem:[#allocation2 + $0x150] sm:$0xff]  ;;  %v78_v24 = vld [vmem:[#allocation2 + $0xc8] sm:$0xff]  ;;  %v190_v26 = vld [vmem:[#allocation4 + $0x40] sm:$0xff] }
  0x14   :  { %202 = vmatpush.msra.mxu0 %v193_v14  ;;  %278 = vmatpush.msra.mxu3 %v97_v15  ;;  %v63_v25 = vld [vmem:[#allocation2 + $0x50] sm:$0xff]  ;;  %v94_v27 = vld [vmem:[#allocation2 + $0x148] sm:$0xff]  ;;  %v77_v28 = vld [vmem:[#allocation2 + $0xc0] sm:$0xff] }
  0x15   :  { %259 = vmatpush.msra.mxu2 %v80_v16  ;;  %238 = vmatpush.msra.mxu1 %v65_v17  ;;  %v62_v29 = vld [vmem:[#allocation2 + $0x48] sm:$0xff]  ;;  %v189_v30 = vld [vmem:[#allocation4 + $0x38] sm:$0xff]  ;;  %v93_v31 = vld [vmem:[#allocation2 + $0x140] sm:$0xff] }
  0x16   :  { %203 = vmatpush.msra.mxu0 %v192_v18  ;;  %279 = vmatpush.msra.mxu3 %v96_v19  ;;  %v76_v32 = vld [vmem:[#allocation2 + $0xb8] sm:$0xff]  ;;  %v61_v33 = vld [vmem:[#allocation2 + $0x40] sm:$0xff]  ;;  %v188_v34 = vld [vmem:[#allocation4 + $0x30] sm:$0xff] }
  0x17   :  { %260 = vmatpush.msra.mxu2 %v79_v20  ;;  %239 = vmatpush.msra.mxu1 %v64_v21  ;;  %v92_v35 = vld [vmem:[#allocation2 + $0x138] sm:$0xff]  ;;  %v75_v36 = vld [vmem:[#allocation2 + $0xb0] sm:$0xff]  ;;  %v187_v38 = vld [vmem:[#allocation4 + $0x28] sm:$0xff] }
  0x18   :  { %204 = vmatpush.msra.mxu0 %v191_v22  ;;  %280 = vmatpush.msra.mxu3 %v95_v23  ;;  %v60_v37 = vld [vmem:[#allocation2 + $0x38] sm:$0xff]  ;;  %v91_v39 = vld [vmem:[#allocation2 + $0x130] sm:$0xff]  ;;  %v74_v40 = vld [vmem:[#allocation2 + $0xa8] sm:$0xff] }
  0x19   :  { %261 = vmatpush.msra.mxu2 %v78_v24  ;;  %240 = vmatpush.msra.mxu1 %v63_v25  ;;  %v59_v41 = vld [vmem:[#allocation2 + $0x30] sm:$0xff]  ;;  %v186_v42 = vld [vmem:[#allocation4 + $0x20] sm:$0xff]  ;;  %v90_v43 = vld [vmem:[#allocation2 + $0x128] sm:$0xff] }
  0x1a   :  { %205 = vmatpush.msra.mxu0 %v190_v26  ;;  %281 = vmatpush.msra.mxu3 %v94_v27  ;;  %v73_v44 = vld [vmem:[#allocation2 + $0xa0] sm:$0xff]  ;;  %v58_v45 = vld [vmem:[#allocation2 + $0x28] sm:$0xff]  ;;  %v185_v46 = vld [vmem:[#allocation4 + $0x18] sm:$0xff] }
  0x1b   :  { %262 = vmatpush.msra.mxu2 %v77_v28  ;;  %241 = vmatpush.msra.mxu1 %v62_v29  ;;  %v89_v47 = vld [vmem:[#allocation2 + $0x120] sm:$0xff]  ;;  %v72_v48 = vld [vmem:[#allocation2 + $0x98] sm:$0xff]  ;;  %v184_v50 = vld [vmem:[#allocation4 + $0x10] sm:$0xff] }
  0x1c   :  { %206 = vmatpush.msra.mxu0 %v189_v30  ;;  %282 = vmatpush.msra.mxu3 %v93_v31  ;;  %v57_v49 = vld [vmem:[#allocation2 + $0x20] sm:$0xff]  ;;  %v88_v51 = vld [vmem:[#allocation2 + $0x118] sm:$0xff]  ;;  %v71_v52 = vld [vmem:[#allocation2 + $0x90] sm:$0xff] }
  0x1d   :  { %263 = vmatpush.msra.mxu2 %v76_v32  ;;  %242 = vmatpush.msra.mxu1 %v61_v33  ;;  %v56_v53 = vld [vmem:[#allocation2 + $0x18] sm:$0xff]  ;;  %v183_v54 = vld [vmem:[#allocation4 + $0x8] sm:$0xff]  ;;  %v87_v55 = vld [vmem:[#allocation2 + $0x110] sm:$0xff] }
  0x1e   :  { %207 = vmatpush.msra.mxu0 %v188_v34  ;;  %283 = vmatpush.msra.mxu3 %v92_v35  ;;  %v70_v56 = vld [vmem:[#allocation2 + $0x88] sm:$0xff]  ;;  %v55_v57 = vld [vmem:[#allocation2 + $0x10] sm:$0xff]  ;;  %v182_v58 = vld [vmem:[#allocation4] sm:$0xff] }
  0x1f   :  { %264 = vmatpush.msra.mxu2 %v75_v36  ;;  %243 = vmatpush.msra.mxu1 %v60_v37  ;;  %v86_v59 = vld [vmem:[#allocation2 + $0x108] sm:$0xff]  ;;  %v116_v60 = vld [vmem:[#allocation2 + $0x1f8] sm:$0xff]  ;;  %v69_v61 = vld [vmem:[#allocation2 + $0x80] sm:$0xff] }
  0x20   :  { %208 = vmatpush.msra.mxu0 %v187_v38  ;;  %284 = vmatpush.msra.mxu3 %v91_v39  ;;  %v148_v62 = vld [vmem:[#allocation2 + $0x2f8] sm:$0xff]  ;;  %v54_v63 = vld [vmem:[#allocation2 + $0x8] sm:$0xff]  ;;  %v115_v0 = vld [vmem:[#allocation2 + $0x1f0] sm:$0xff] }
  0x21   :  { %265 = vmatpush.msra.mxu2 %v74_v40  ;;  %244 = vmatpush.msra.mxu1 %v59_v41  ;;  %v85_v1 = vld [vmem:[#allocation2 + $0x100] sm:$0xff]  ;;  %v147_v2 = vld [vmem:[#allocation2 + $0x2f0] sm:$0xff]  ;;  %v164_v3 = vld [vmem:[#allocation2 + $0x378] sm:$0xff] }
  0x22   :  { %209 = vmatpush.msra.mxu0 %v186_v42  ;;  %285 = vmatpush.msra.mxu3 %v90_v43  ;;  %v114_v4 = vld [vmem:[#allocation2 + $0x1e8] sm:$0xff]  ;;  %v53_v5 = vld [vmem:[#allocation2] sm:$0xff]  ;;  %v132_v6 = vld [vmem:[#allocation2 + $0x278] sm:$0xff] }
  0x23   :  { %266 = vmatpush.msra.mxu2 %v73_v44  ;;  %245 = vmatpush.msra.mxu1 %v58_v45  ;;  %v146_v7 = vld [vmem:[#allocation2 + $0x2e8] sm:$0xff]  ;;  %v113_v8 = vld [vmem:[#allocation2 + $0x1e0] sm:$0xff]  ;;  %v163_v9 = vld [vmem:[#allocation2 + $0x370] sm:$0xff] }
  0x24   :  { %210 = vmatpush.msra.mxu0 %v185_v46  ;;  %286 = vmatpush.msra.mxu3 %v89_v47  ;;  %v131_v10 = vld [vmem:[#allocation2 + $0x270] sm:$0xff]  ;;  %v145_v11 = vld [vmem:[#allocation2 + $0x2e0] sm:$0xff]  ;;  %v112_v12 = vld [vmem:[#allocation2 + $0x1d8] sm:$0xff] }
  0x25   :  { %267 = vmatpush.msra.mxu2 %v72_v48  ;;  %246 = vmatpush.msra.mxu1 %v57_v49  ;;  %v162_v13 = vld [vmem:[#allocation2 + $0x368] sm:$0xff]  ;;  %v144_v15 = vld [vmem:[#allocation2 + $0x2d8] sm:$0xff]  ;;  %v111_v16 = vld [vmem:[#allocation2 + $0x1d0] sm:$0xff] }
  0x26   :  { %211 = vmatpush.msra.mxu0 %v184_v50  ;;  %287 = vmatpush.msra.mxu3 %v88_v51  ;;  %v130_v14 = vld [vmem:[#allocation2 + $0x268] sm:$0xff]  ;;  %v161_v17 = vld [vmem:[#allocation2 + $0x360] sm:$0xff]  ;;  %v143_v19 = vld [vmem:[#allocation2 + $0x2d0] sm:$0xff] }
  0x27   :  { %268 = vmatpush.msra.mxu2 %v71_v52  ;;  %247 = vmatpush.msra.mxu1 %v56_v53  ;;  %v129_v18 = vld [vmem:[#allocation2 + $0x260] sm:$0xff]  ;;  %v110_v20 = vld [vmem:[#allocation2 + $0x1c8] sm:$0xff]  ;;  %v160_v21 = vld [vmem:[#allocation2 + $0x358] sm:$0xff] }
  0x28   :  { %212 = vmatpush.msra.mxu0 %v183_v54  ;;  %288 = vmatpush.msra.mxu3 %v87_v55  ;;  %v128_v22 = vld [vmem:[#allocation2 + $0x258] sm:$0xff]  ;;  %v142_v23 = vld [vmem:[#allocation2 + $0x2c8] sm:$0xff]  ;;  %v109_v24 = vld [vmem:[#allocation2 + $0x1c0] sm:$0xff] }
  0x29   :  { %269 = vmatpush.msra.mxu2 %v70_v56  ;;  %248 = vmatpush.msra.mxu1 %v55_v57  ;;  %v159_v25 = vld [vmem:[#allocation2 + $0x350] sm:$0xff]  ;;  %v141_v27 = vld [vmem:[#allocation2 + $0x2c0] sm:$0xff]  ;;  %v108_v28 = vld [vmem:[#allocation2 + $0x1b8] sm:$0xff] }
  0x2a   :  { %213 = vmatpush.msra.mxu0 %v182_v58  ;;  %289 = vmatpush.msra.mxu3 %v86_v59  ;;  %v127_v26 = vld [vmem:[#allocation2 + $0x250] sm:$0xff]  ;;  %v158_v29 = vld [vmem:[#allocation2 + $0x348] sm:$0xff]  ;;  %v140_v31 = vld [vmem:[#allocation2 + $0x2b8] sm:$0xff] }
  0x2b   :  { %270 = vmatpush.msra.mxu2 %v69_v61  ;;  %249 = vmatpush.msra.mxu1 %v54_v63  ;;  %v126_v30 = vld [vmem:[#allocation2 + $0x248] sm:$0xff]  ;;  %v107_v32 = vld [vmem:[#allocation2 + $0x1b0] sm:$0xff]  ;;  %v157_v33 = vld [vmem:[#allocation2 + $0x340] sm:$0xff] }
  0x2c   :  { %295 = vmatpush.msrb.mxu0 %v116_v60  ;;  %290 = vmatpush.msra.mxu3 %v85_v1  ;;  %v125_v34 = vld [vmem:[#allocation2 + $0x240] sm:$0xff]  ;;  %v139_v35 = vld [vmem:[#allocation2 + $0x2b0] sm:$0xff]  ;;  %v106_v36 = vld [vmem:[#allocation2 + $0x1a8] sm:$0xff] }
  0x2d   :  { %335 = vmatpush.msrb.mxu2 %v148_v62  ;;  %250 = vmatpush.msra.mxu1 %v53_v5  ;;  %v156_v37 = vld [vmem:[#allocation2 + $0x338] sm:$0xff]  ;;  %v138_v39 = vld [vmem:[#allocation2 + $0x2a8] sm:$0xff]  ;;  %v527_v40 = vld [vmem:[%s546_s0] sm:$0xff] }
  0x2e   :  { %296 = vmatpush.msrb.mxu0 %v115_v0  ;;  %355 = vmatpush.msrb.mxu3 %v164_v3  ;;  %v124_v38 = vld [vmem:[#allocation2 + $0x238] sm:$0xff]  ;;  %v105_v41 = vld [vmem:[#allocation2 + $0x1a0] sm:$0xff]  ;;  %v155_v42 = vld [vmem:[#allocation2 + $0x330] sm:$0xff]  ;;  %v220_v47 = vperm.slane %v527_v40, 1  ;;  %v221_v53 = vperm.slane %v527_v40, 2  ;;  %v219_v59 = vperm.slane %v527_v40, 0 }
  0x2f   :  { %336 = vmatpush.msrb.mxu2 %v147_v2  ;;  %315 = vmatpush.msrb.mxu1 %v132_v6  ;;  %v123_v43 = vld [vmem:[#allocation2 + $0x230] sm:$0xff]  ;;  %v137_v44 = vld [vmem:[#allocation2 + $0x2a0] sm:$0xff]  ;;  %v104_v45 = vld [vmem:[#allocation2 + $0x198] sm:$0xff]  ;;  %v224_v3 = vperm.slane %v527_v40, 5 }
  0x30   :  { %297 = vmatpush.msrb.mxu0 %v114_v4  ;;  %356 = vmatpush.msrb.mxu3 %v163_v9  ;;  %v154_v46 = vld [vmem:[#allocation2 + $0x328] sm:$0xff]  ;;  %v103_v49 = vld [vmem:[#allocation2 + $0x190] sm:$0xff]  ;;  %v136_v50 = vld [vmem:[#allocation2 + $0x298] sm:$0xff]  ;;  %v225_v9 = vperm.slane %v527_v40, 6 }
  0x31   :  { %337 = vmatpush.msrb.mxu2 %v146_v7  ;;  %316 = vmatpush.msrb.mxu1 %v131_v10  ;;  %v122_v48 = vld [vmem:[#allocation2 + $0x228] sm:$0xff]  ;;  %v153_v51 = vld [vmem:[#allocation2 + $0x320] sm:$0xff]  ;;  %v135_v56 = vld [vmem:[#allocation2 + $0x290] sm:$0xff]  ;;  %v222_v7 = vperm.slane %v527_v40, 3 }
  0x32   :  { %298 = vmatpush.msrb.mxu0 %v113_v8  ;;  %357 = vmatpush.msrb.mxu3 %v162_v13  ;;  %v181_v52 = vld [vmem:[%s547_s1] sm:$0x1]  ;;  %v102_v54 = vld [vmem:[#allocation2 + $0x188] sm:$0xff]  ;;  %v152_v58 = vld [vmem:[#allocation2 + $0x318] sm:$0xff] }
  0x33   :  { %338 = vmatpush.msrb.mxu2 %v145_v11  ;;  %317 = vmatpush.msrb.mxu1 %v130_v14  ;;  %v121_v55 = vld [vmem:[#allocation2 + $0x220] sm:$0xff]  ;;  %v180_v60 = vld [vmem:[#allocation2 + $0x3f8] sm:$0xff]  ;;  %v134_v62 = vld [vmem:[#allocation2 + $0x288] sm:$0xff] }
  0x34   :  { %299 = vmatpush.msrb.mxu0 %v112_v12  ;;  %358 = vmatpush.msrb.mxu3 %v161_v17  ;;  %v101_v57 = vld [vmem:[#allocation2 + $0x180] sm:$0xff]  ;;  %v120_v61 = vld [vmem:[#allocation2 + $0x218] sm:$0xff]  ;;  %v151_v63 = vld [vmem:[#allocation2 + $0x310] sm:$0xff]  ;;  %v223_v12 = vperm.slane %v527_v40, 4 }
  0x35   :  { %339 = vmatpush.msrb.mxu2 %v144_v15  ;;  %318 = vmatpush.msrb.mxu1 %v129_v18  ;;  %v179_v0 = vld [vmem:[#allocation2 + $0x3f0] sm:$0xff]  ;;  %v133_v2 = vld [vmem:[#allocation2 + $0x280] sm:$0xff]  ;;  %v150_v4 = vld [vmem:[#allocation2 + $0x308] sm:$0xff] }
  0x36   :  { %300 = vmatpush.msrb.mxu0 %v111_v16  ;;  %359 = vmatpush.msrb.mxu3 %v160_v21  ;;  %v119_v1 = vld [vmem:[#allocation2 + $0x210] sm:$0xff]  ;;  %v178_v5 = vld [vmem:[#allocation2 + $0x3e8] sm:$0xff]  ;;  %v149_v8 = vld [vmem:[#allocation2 + $0x300] sm:$0xff] }
  0x37   :  { %340 = vmatpush.msrb.mxu2 %v143_v19  ;;  %319 = vmatpush.msrb.mxu1 %v128_v22  ;;  %v118_v6 = vld [vmem:[#allocation2 + $0x208] sm:$0xff]  ;;  %v177_v10 = vld [vmem:[#allocation2 + $0x3e0] sm:$0xff]  ;;  %v176_v13 = vld [vmem:[#allocation2 + $0x3d8] sm:$0xff] }
  0x38   :  { %301 = vmatpush.msrb.mxu0 %v110_v20  ;;  %360 = vmatpush.msrb.mxu3 %v159_v25  ;;  %v117_v11 = vld [vmem:[#allocation2 + $0x200] sm:$0xff]  ;;  %v175_v14 = vld [vmem:[#allocation2 + $0x3d0] sm:$0xff]  ;;  %v174_v15 = vld [vmem:[#allocation2 + $0x3c8] sm:$0xff]  ;;  %v226_v25 = vperm.slane %v527_v40, 7 }
  0x39   :  { %341 = vmatpush.msrb.mxu2 %v142_v23  ;;  %320 = vmatpush.msrb.mxu1 %v127_v26  ;;  %v173_v16 = vld [vmem:[#allocation2 + $0x3c0] sm:$0xff]  ;;  %v172_v17 = vld [vmem:[#allocation2 + $0x3b8] sm:$0xff]  ;;  %v171_v18 = vld [vmem:[#allocation2 + $0x3b0] sm:$0xff] }
  0x3a   :  { %302 = vmatpush.msrb.mxu0 %v109_v24  ;;  %361 = vmatpush.msrb.mxu3 %v158_v29  ;;  %v170_v19 = vld [vmem:[#allocation2 + $0x3a8] sm:$0xff]  ;;  %v169_v20 = vld [vmem:[#allocation2 + $0x3a0] sm:$0xff]  ;;  %v168_v21 = vld [vmem:[#allocation2 + $0x398] sm:$0xff] }
  0x3b   :  { %342 = vmatpush.msrb.mxu2 %v141_v27  ;;  %321 = vmatpush.msrb.mxu1 %v126_v30  ;;  %v167_v22 = vld [vmem:[#allocation2 + $0x390] sm:$0xff]  ;;  %v166_v23 = vld [vmem:[#allocation2 + $0x388] sm:$0xff]  ;;  %v165_v24 = vld [vmem:[#allocation2 + $0x380] sm:$0xff] }
  0x3c   :  { %303 = vmatpush.msrb.mxu0 %v108_v28  ;;  %362 = vmatpush.msrb.mxu3 %v157_v33  ;;  %v395_v40 = vld [vmem:[%s550_s4] sm:$0x1] }
  0x3d   :  { %343 = vmatpush.msrb.mxu2 %v140_v31  ;;  %322 = vmatpush.msrb.mxu1 %v125_v34 }
  0x3e   :  { %304 = vmatpush.msrb.mxu0 %v107_v32  ;;  %363 = vmatpush.msrb.mxu3 %v156_v37 }
  0x3f   :  { %344 = vmatpush.msrb.mxu2 %v139_v35  ;;  %323 = vmatpush.msrb.mxu1 %v124_v38 }
  0x40   :  { %305 = vmatpush.msrb.mxu0 %v106_v36  ;;  %364 = vmatpush.msrb.mxu3 %v155_v42 }
  0x41   :  { %345 = vmatpush.msrb.mxu2 %v138_v39  ;;  %324 = vmatpush.msrb.mxu1 %v123_v43 }
  0x42   :  { %306 = vmatpush.msrb.mxu0 %v105_v41  ;;  %365 = vmatpush.msrb.mxu3 %v154_v46 }
  0x43   :  { %346 = vmatpush.msrb.mxu2 %v137_v44  ;;  %325 = vmatpush.msrb.mxu1 %v122_v48 }
  0x44   :  { %307 = vmatpush.msrb.mxu0 %v104_v45  ;;  %271 = vmatmul.f32.vlgmr.msra.gmra.mxu2 %v220_v47 }
  0x45   :  { %347 = vmatpush.msrb.mxu2 %v136_v50  ;;  %366 = vmatpush.msrb.mxu3 %v153_v51 }
  0x46   :  { %308 = vmatpush.msrb.mxu0 %v103_v49  ;;  %291 = vmatmul.f32.vlgmr.msra.gmra.mxu3 %v221_v53 }
  0x47   :  { %214 = vmatmul.f32.vlgmr.msra.gmra.mxu0 %v181_v52  ;;  %326 = vmatpush.msrb.mxu1 %v121_v55 }
  0x48   :  { %309 = vmatpush.msrb.mxu0 %v102_v54  ;;  %348 = vmatpush.msrb.mxu2 %v135_v56 }
  0x49   :  { %367 = vmatpush.msrb.mxu3 %v152_v58  ;;  %251 = vmatmul.f32.vlgmr.msra.gmra.mxu1 %v219_v59 }
  0x4a   :  { %310 = vmatpush.msrb.mxu0 %v101_v57  ;;  %327 = vmatpush.msrb.mxu1 %v120_v61 }
  0x4b   :  { %349 = vmatpush.msrb.mxu2 %v134_v62  ;;  %368 = vmatpush.msrb.mxu3 %v151_v63 }
  0x4c   :  { %375 = vmatpush.msra.mxu0 %v180_v60  ;;  %328 = vmatpush.msrb.mxu1 %v119_v1 }
  0x4d   :  { %350 = vmatpush.msrb.mxu2 %v133_v2  ;;  %369 = vmatpush.msrb.mxu3 %v150_v4 }
  0x4e   :  { %376 = vmatpush.msra.mxu0 %v179_v0  ;;  %351 = vmatmul.f32.vlgmr.msrb.gmra.mxu2 %v224_v3 }
  0x4f   :  { %329 = vmatpush.msrb.mxu1 %v118_v6  ;;  %370 = vmatpush.msrb.mxu3 %v149_v8 }
  0x50   :  { %377 = vmatpush.msra.mxu0 %v178_v5  ;;  %371 = vmatmul.f32.vlgmr.msrb.gmra.mxu3 %v225_v9 }
  0x51   :  { %311 = vmatmul.f32.vlgmr.msrb.gmra.mxu0 %v222_v7  ;;  %330 = vmatpush.msrb.mxu1 %v117_v11 }
  0x52   :  { %378 = vmatpush.msra.mxu0 %v177_v10  ;;  %331 = vmatmul.f32.vlgmr.msrb.gmra.mxu1 %v223_v12 }
  0x54   :  { %379 = vmatpush.msra.mxu0 %v176_v13 }
  0x56   :  { %380 = vmatpush.msra.mxu0 %v175_v14 }
  0x58   :  { %381 = vmatpush.msra.mxu0 %v174_v15 }
  0x5a   :  { %382 = vmatpush.msra.mxu0 %v173_v16 }
  0x5c   :  { %383 = vmatpush.msra.mxu0 %v172_v17 }
  0x5e   :  { %384 = vmatpush.msra.mxu0 %v171_v18 }
  0x60   :  { %385 = vmatpush.msra.mxu0 %v170_v19 }
  0x62   :  { %386 = vmatpush.msra.mxu0 %v169_v20 }
  0x64   :  { %387 = vmatpush.msra.mxu0 %v168_v21 }
  0x66   :  { %388 = vmatpush.msra.mxu0 %v167_v22 }
  0x68   :  { %389 = vmatpush.msra.mxu0 %v166_v23 }
  0x6a   :  { %390 = vmatpush.msra.mxu0 %v165_v24 }
  0x6b   :  { %391 = vmatmul.f32.vlgmr.msra.gmra.mxu0 %v226_v25 }
  0xc4   :  { %v215_v27 = vpop.f32.mrf.mxu0 }
  0xc6   :  { %v252_v26 = vpop.f32.mrf.mxu1 }
  0xc7   :  { %v253_v28 = vadd.f32 %v252_v26, %v215_v27  ;;  %v272_v29 = vpop.f32.mrf.mxu2 }
  0xc9   :  { %v273_v30 = vadd.f32 %v272_v29, %v253_v28  ;;  %v292_v31 = vpop.f32.mrf.mxu3 }
  0xcb   :  { %v293_v32 = vadd.f32 %v292_v31, %v273_v30 }
  0xce   :  { %v312_v33 = vpop.f32.mrf.mxu0 }
  0xcf   :  { %v313_v34 = vadd.f32 %v312_v33, %v293_v32  ;;  %v332_v35 = vpop.f32.mrf.mxu1 }
  0xd1   :  { %v333_v36 = vadd.f32 %v332_v35, %v313_v34  ;;  %v352_v37 = vpop.f32.mrf.mxu2 }
  0xd3   :  { %v353_v38 = vadd.f32 %v352_v37, %v333_v36  ;;  %v372_v39 = vpop.f32.mrf.mxu3 }
  0xd5   :  { %v373_v41 = vadd.f32 %v372_v39, %v353_v38 }
  0xe8   :  { %v392_v42 = vpop.f32.mrf.mxu0 }
  0xe9   :  { %v393_v43 = vadd.f32 %v392_v42, %v373_v41 }
  0xeb   :  { %v396_v44 = vadd.f32 %v395_v40, %v393_v43 }
  0xed   :  { %v423_v45 = vmul.f32 -1.442695, %v396_v44 }
  0xef   :  { %428 = vpow2.f32 %v423_v45 }
  0xf5   :  { %v429_v46 = vpop.eup %428 }
  0xf6   :  { %v400_v47 = vadd.f32 1.0, %v429_v46 }
  0xf8   :  { %430 = vrcp.f32 %v400_v47  ;;  %v412_v51 = vand.u32 2147483648, %v400_v47  ;;  %v410_v53 = vand.u32 2147483647, %v400_v47  ;;  %vm406_vm1 = vweird.f32 %v400_v47 }
  0xfa   :  { %v413_v55 = vor.u32 1.1754944e-38, %v412_v51  ;;  %vm411_vm3 = vcmp.eq.f32.partialorder %v410_v53, 8.507059e+37 }
  0xfe   :  { %v431_v48 = vpop.eup %430 }
  0xff   :  { %v402_v49 = vmul.f32 %v431_v48, %v400_v47  ;;  %vm407_vm0 = vweird.f32 %v431_v48 }
 0x100   :  { %vm408_vm2 = vmor %vm406_vm1, %vm407_vm0 }
 0x101   :  { %v403_v50 = vsub.f32 1.0, %v402_v49 }
 0x103   :  { %v404_v52 = vmul.f32 %v431_v48, %v403_v50 }
 0x105   :  { %v405_v54 = vadd.f32 %v431_v48, %v404_v52 }
 0x107   :  { %v409_v56 = vsel %vm408_vm2, %v431_v48, %v405_v54 }
 0x108   :  { %v414_v57 = vsel %vm411_vm3, %v413_v55, %v409_v56 }
 0x109   :  { %416 = vst [vmem:[%s551_s5] sm:$0x1] %v414_v57 }
 0x10a   :  { %421 = vsyncpa [#allocation3], 1 }
 0x10b   :  { %422 = vsyncpa [#allocation5], 1 }

</bundles_post_ra>
